<compile_context>
chip_gen: v6e
topology: v6e:2x2x1
jax: 0.10.0
libtpu: 0.0.40
codegen_flags: <defaults>
</compile_context>

<pallas_src>
import functools

import jax
import jax.numpy as jnp
from jax import lax
from jax.experimental import pallas as pl
from jax.experimental.pallas import tpu as pltpu


def _focal_loss_kernel(logits_ref, targets_ref, loss_ref, m_ref, s_ref, xt_ref,
                       *, gamma, n_rows, n_cols, tn, c_chunk):
    # logits_ref : (tn, c_chunk) native dtype, VMEM
    # targets_ref: (tn, 1) int32, VMEM
    # loss_ref   : (tn, 1) f32 per-row loss (written at last class chunk)
    # m_ref/s_ref/xt_ref: (tn, 1) f32 VMEM scratch (running max / exp-sum / target logit)
    i = pl.program_id(0)          # row tile   (parallel across TensorCores)
    j = pl.program_id(1)          # class chunk (reduction axis, arbitrary)

    @pl.when(j == 0)
    def _():
        m_ref[...] = jnp.full(m_ref.shape, -jnp.inf, dtype=jnp.float32)
        s_ref[...] = jnp.zeros(s_ref.shape, dtype=jnp.float32)
        xt_ref[...] = jnp.zeros(xt_ref.shape, dtype=jnp.float32)

    x = logits_ref[...]           # (tn, c_chunk), bf16 stays bf16
    t = targets_ref[...]          # (tn, 1) int32

    col = j * c_chunk + lax.broadcasted_iota(jnp.int32, x.shape, 1)

    # Mask garbage lanes of the (possibly partial) last class chunk.
    if n_cols % c_chunk != 0:
        x_m = jnp.where(col < n_cols, x, jnp.array(-jnp.inf, dtype=x.dtype))
    else:
        x_m = x

    # Online log-sum-exp (f32 accumulation, native-dtype max is exact).
    m_prev = m_ref[...]
    m_new = jnp.maximum(m_prev,
                        jnp.max(x_m, axis=-1, keepdims=True).astype(jnp.float32))
    s_ref[...] = s_ref[...] * jnp.exp(m_prev - m_new) + jnp.sum(
        jnp.exp(x_m.astype(jnp.float32) - m_new), axis=-1, keepdims=True)
    m_ref[...] = m_new

    # Target-logit gather folded into the same chunk pass (exact in native dtype:
    # at most one non-zero term per row).
    xt_ref[...] += jnp.sum(
        jnp.where(col == t, x, jnp.zeros_like(x)), axis=-1, keepdims=True
    ).astype(jnp.float32)

    @pl.when(j == pl.num_programs(1) - 1)
    def _():
        row = i * tn + lax.broadcasted_iota(jnp.int32, t.shape, 0)
        # ignore_index = -1, out-of-range targets, and OOB tail rows contribute 0.
        valid = (t >= 0) & (t < n_cols) & (row < n_rows)
        lse = m_ref[...] + jnp.log(s_ref[...])
        logpt = jnp.where(valid, xt_ref[...] - lse, 0.0)
        pt = jnp.exp(logpt)
        one_minus_pt = jnp.maximum(1.0 - pt, 0.0)      # NaN-proof vs fp rounding
        g = float(gamma)
        if g == int(g) and 0 <= int(g) <= 4:
            focal = jnp.ones_like(one_minus_pt)
            for _ in range(int(g)):
                focal = focal * one_minus_pt           # VPU multiplies, no EUP pow
        else:
            focal = one_minus_pt ** g
        loss_ref[...] = focal * logpt                  # 0 for ignored / padded rows


def focal_loss(logits, targets, *, gamma=2.0, max_rows_per_tile=1024,
               max_class_chunk=512, per_buffer_budget=2 * 1024 * 1024):
    """Pallas focal loss (mean reduction). logits [N, C], targets [N] int (ignore_index=-1)."""
    n, c = logits.shape
    dtype_bytes = jnp.dtype(logits.dtype).itemsize

    # Class-chunk: whole C when small, else 512-lane chunks (multiple of 128).
    c_chunk = c if c <= max_class_chunk else max_class_chunk

    # Row tile: ~2 MiB per native-dtype logits buffer (double-buffered by Pallas);
    # conservative for v7x (64 MiB VMEM) while staying near HBM roofline.
    row_bytes = max(1, c_chunk * dtype_bytes)
    tn = (per_buffer_budget // row_bytes) // 8 * 8
    tn = max(8, min(int(max_rows_per_tile), tn))
    tn = min(tn, (n + 7) // 8 * 8)

    grid = (pl.cdiv(n, tn), pl.cdiv(c, c_chunk))

    t2 = targets.astype(jnp.int32).reshape(n, 1)

    kernel = functools.partial(_focal_loss_kernel, gamma=gamma, n_rows=n,
                               n_cols=c, tn=tn, c_chunk=c_chunk)

    bytes_accessed = n * c * dtype_bytes + grid[1] * n * 4 + n * 4
    cost = pl.CostEstimate(
        flops=6 * n * c,
        transcendentals=n * c + 3 * n,
        bytes_accessed=bytes_accessed,
    )

    per_row = pl.pallas_call(
        kernel,
        out_shape=jax.ShapeDtypeStruct((n, 1), jnp.float32),
        grid=grid,
        in_specs=[
            pl.BlockSpec((tn, c_chunk), lambda i, j: (i, j)),   # logits, native dtype
            pl.BlockSpec((tn, 1), lambda i, j: (i, 0)),         # targets
        ],
        out_specs=pl.BlockSpec((tn, 1), lambda i, j: (i, 0)),   # per-row loss
        scratch_shapes=[
            pltpu.VMEM((tn, 1), jnp.float32),   # running max
            pltpu.VMEM((tn, 1), jnp.float32),   # running exp-sum
            pltpu.VMEM((tn, 1), jnp.float32),   # target logit
        ],
        compiler_params=pltpu.CompilerParams(
            dimension_semantics=("parallel", "arbitrary"),
            vmem_limit_bytes=32 * 1024 * 1024,
        ),
        cost_estimate=cost,
    )(logits, t2)

    # reduction='mean' on the module's loss vector: denominator counts ALL rows,
    # including ignore_index rows (matches `(-CE(reduction='none')).mean()`).
    return -jnp.sum(per_row) / jnp.float32(n)


def _focal_loss_ref(logits, targets, *, gamma=2.0, ignore_index=-1):
    # pure-JAX reference mirroring the PyTorch module semantics
    logp = jax.nn.log_softmax(logits.astype(jnp.float32), axis=-1)
    valid = targets != ignore_index
    safe_t = jnp.where(valid, targets, 0)
    logpt = jnp.where(
        valid, jnp.take_along_axis(logp, safe_t[:, None], axis=-1)[:, 0], 0.0
    )
    pt = jnp.exp(logpt)
    loss = (1.0 - pt) ** gamma * logpt
    return -jnp.mean(loss)


if __name__ == "__main__":
    key = jax.random.PRNGKey(0)
    k1, k2, k3, k4, k5, k6 = jax.random.split(key, 6)

    # Case 1: small, single tile, exercises ignore_index path.
    N, C = 8, 16
    logits = jax.random.normal(k1, (N, C), dtype=jnp.float32)
    targets = jax.random.randint(k2, (N,), 0, C, dtype=jnp.int32)
    targets = targets.at[3].set(-1)
    out = jax.block_until_ready(focal_loss(logits, targets, gamma=2.0))
    ref = _focal_loss_ref(logits, targets, gamma=2.0)
    assert jnp.allclose(out, ref, atol=1e-5, rtol=1e-5), (out, ref)

    # Case 2: N not a multiple of the (forced-small) row tile -> multiple parallel
    # row tiles + unpadded OOB tail rows; bf16 inputs.
    N2, C2 = 20, 16
    logits2 = jax.random.normal(k3, (N2, C2), dtype=jnp.bfloat16)
    targets2 = jax.random.randint(k4, (N2,), 0, C2, dtype=jnp.int32)
    targets2 = targets2.at[0].set(-1)
    targets2 = targets2.at[17].set(-1)
    out2 = jax.block_until_ready(
        focal_loss(logits2, targets2, gamma=2.0, max_rows_per_tile=8))
    ref2 = _focal_loss_ref(logits2.astype(jnp.float32), targets2, gamma=2.0)
    assert jnp.allclose(out2, ref2, atol=2e-3, rtol=2e-3), (out2, ref2)

    # Case 3: C larger than the class chunk -> online LSE across chunks with a
    # masked partial last chunk.
    N3, C3 = 64, 700
    logits3 = jax.random.normal(k5, (N3, C3), dtype=jnp.float32)
    targets3 = jax.random.randint(k6, (N3,), 0, C3, dtype=jnp.int32)
    targets3 = targets3.at[5].set(-1)
    out3 = jax.block_until_ready(focal_loss(logits3, targets3, gamma=2.0))
    ref3 = _focal_loss_ref(logits3, targets3, gamma=2.0)
    assert jnp.allclose(out3, ref3, atol=1e-5, rtol=1e-5), (out3, ref3)

    print("KERNEL_OK")
</pallas_src>

<mosaic_0001>
module attributes {stable_mosaic.version = 11 : i64} {
  func.func @_focal_loss_kernel(%arg0: i32, %arg1: i32, %arg2: memref<8x16xf32, #tpu.memory_space<vmem>>, %arg3: memref<8x1xi32, #tpu.memory_space<vmem>>, %arg4: memref<8x1xf32, #tpu.memory_space<vmem>>, %arg5: memref<8x1xf32, #tpu.memory_space<vmem>>, %arg6: memref<8x1xf32, #tpu.memory_space<vmem>>, %arg7: memref<8x1xf32, #tpu.memory_space<vmem>>) attributes {dimension_semantics = [#tpu.dimension_semantics<parallel>, #tpu.dimension_semantics<arbitrary>], iteration_bounds = array<i64: 1, 1>, scalar_prefetch = 0 : i64, scratch_operands = 3 : i64, tpu.core_type = #tpu.core_type<tc>, window_params = [{transform_indices = @transform_0, window_bounds = array<i64: 8, 16>}, {transform_indices = @transform_1, window_bounds = array<i64: 8, 1>}, {transform_indices = @transform_2, window_bounds = array<i64: 8, 1>}]} {
    %c0_i32 = arith.constant 0 : i32
    %0 = arith.cmpi eq, %arg1, %c0_i32 : i32
    %1 = arith.extui %0 : i1 to i32
    %c0_i32_0 = arith.constant 0 : i32
    %2 = arith.cmpi ne, %1, %c0_i32_0 : i32
    scf.if %2 {
      %cst_21 = arith.constant 0xFF800000 : f32
      %37 = vector.broadcast %cst_21 : f32 to vector<8x1xf32>
      %c0_22 = arith.constant 0 : index
      %c0_23 = arith.constant 0 : index
      %38 = vector.load %arg5[%c0_22, %c0_23] : memref<8x1xf32, #tpu.memory_space<vmem>>, vector<8x1xf32>
      tpu.vector_store %arg5[%c0_22, %c0_23], %37 {strides = array<i32>} : memref<8x1xf32, #tpu.memory_space<vmem>>, vector<8x1xf32>,
      %cst_24 = arith.constant 0.000000e+00 : f32
      %39 = vector.broadcast %cst_24 : f32 to vector<8x1xf32>
      %c0_25 = arith.constant 0 : index
      %c0_26 = arith.constant 0 : index
      %40 = vector.load %arg6[%c0_25, %c0_26] : memref<8x1xf32, #tpu.memory_space<vmem>>, vector<8x1xf32>
      tpu.vector_store %arg6[%c0_25, %c0_26], %39 {strides = array<i32>} : memref<8x1xf32, #tpu.memory_space<vmem>>, vector<8x1xf32>,
      %cst_27 = arith.constant 0.000000e+00 : f32
      %41 = vector.broadcast %cst_27 : f32 to vector<8x1xf32>
      %c0_28 = arith.constant 0 : index
      %c0_29 = arith.constant 0 : index
      %42 = vector.load %arg7[%c0_28, %c0_29] : memref<8x1xf32, #tpu.memory_space<vmem>>, vector<8x1xf32>
      tpu.vector_store %arg7[%c0_28, %c0_29], %41 {strides = array<i32>} : memref<8x1xf32, #tpu.memory_space<vmem>>, vector<8x1xf32>,
    } else {
    }
    %c0 = arith.constant 0 : index
    %c0_1 = arith.constant 0 : index
    %3 = vector.load %arg2[%c0, %c0_1] : memref<8x16xf32, #tpu.memory_space<vmem>>, vector<8x16xf32>
    %c0_2 = arith.constant 0 : index
    %c0_3 = arith.constant 0 : index
    %4 = vector.load %arg3[%c0_2, %c0_3] : memref<8x1xi32, #tpu.memory_space<vmem>>, vector<8x1xi32>
    %c16_i32 = arith.constant 16 : i32
    %5 = arith.muli %arg1, %c16_i32 : i32
    %6 = tpu.iota {dimensions = array<i32: 1>} : vector<8x16xi32>
    %7 = vector.broadcast %5 : i32 to vector<8x16xi32>
    %8 = arith.addi %7, %6 : vector<8x16xi32>
    %c0_4 = arith.constant 0 : index
    %c0_5 = arith.constant 0 : index
    %9 = vector.load %arg5[%c0_4, %c0_5] : memref<8x1xf32, #tpu.memory_space<vmem>>, vector<8x1xf32>
    %cst = arith.constant dense<0xFF800000> : vector<8xf32>
    %10 = vector.multi_reduction <maximumf>, %3, %cst [1] : vector<8x16xf32> to vector<8xf32>
    %11 = vector.shape_cast %10 : vector<8xf32> to vector<8x1xf32>
    %12 = arith.maximumf %9, %11 : vector<8x1xf32>
    %c0_6 = arith.constant 0 : index
    %c0_7 = arith.constant 0 : index
    %13 = vector.load %arg6[%c0_6, %c0_7] : memref<8x1xf32, #tpu.memory_space<vmem>>, vector<8x1xf32>
    %14 = arith.subf %9, %12 : vector<8x1xf32>
    %15 = math.exp %14 : vector<8x1xf32>
    %16 = arith.mulf %13, %15 : vector<8x1xf32>
    %17 = vector.broadcast %12 : vector<8x1xf32> to vector<8x16xf32>
    %18 = arith.subf %3, %17 : vector<8x16xf32>
    %19 = math.exp %18 : vector<8x16xf32>
    %cst_8 = arith.constant dense<0.000000e+00> : vector<8xf32>
    %20 = vector.multi_reduction <add>, %19, %cst_8 [1] : vector<8x16xf32> to vector<8xf32>
    %21 = vector.shape_cast %20 : vector<8xf32> to vector<8x1xf32>
    %22 = arith.addf %16, %21 : vector<8x1xf32>
    %c0_9 = arith.constant 0 : index
    %c0_10 = arith.constant 0 : index
    %23 = vector.load %arg6[%c0_9, %c0_10] : memref<8x1xf32, #tpu.memory_space<vmem>>, vector<8x1xf32>
    tpu.vector_store %arg6[%c0_9, %c0_10], %22 {strides = array<i32>} : memref<8x1xf32, #tpu.memory_space<vmem>>, vector<8x1xf32>,
    %c0_11 = arith.constant 0 : index
    %c0_12 = arith.constant 0 : index
    %24 = vector.load %arg5[%c0_11, %c0_12] : memref<8x1xf32, #tpu.memory_space<vmem>>, vector<8x1xf32>
    tpu.vector_store %arg5[%c0_11, %c0_12], %12 {strides = array<i32>} : memref<8x1xf32, #tpu.memory_space<vmem>>, vector<8x1xf32>,
    %c0_13 = arith.constant 0 : index
    %c0_14 = arith.constant 0 : index
    %25 = vector.load %arg7[%c0_13, %c0_14] : memref<8x1xf32, #tpu.memory_space<vmem>>, vector<8x1xf32>
    %26 = vector.broadcast %4 : vector<8x1xi32> to vector<8x16xi32>
    %27 = arith.cmpi eq, %8, %26 : vector<8x16xi32>
    %cst_15 = arith.constant 0.000000e+00 : f32
    %28 = vector.broadcast %cst_15 : f32 to vector<8x16xf32>
    %29 = arith.select %27, %3, %28 : vector<8x16xi1>, vector<8x16xf32>
    %cst_16 = arith.constant dense<0.000000e+00> : vector<8xf32>
    %30 = vector.multi_reduction <add>, %29, %cst_16 [1] : vector<8x16xf32> to vector<8xf32>
    %31 = vector.shape_cast %30 : vector<8xf32> to vector<8x1xf32>
    %32 = arith.addf %25, %31 : vector<8x1xf32>
    %c0_17 = arith.constant 0 : index
    %c0_18 = arith.constant 0 : index
    %33 = vector.load %arg7[%c0_17, %c0_18] : memref<8x1xf32, #tpu.memory_space<vmem>>, vector<8x1xf32>
    tpu.vector_store %arg7[%c0_17, %c0_18], %32 {strides = array<i32>} : memref<8x1xf32, #tpu.memory_space<vmem>>, vector<8x1xf32>,
    %c0_i32_19 = arith.constant 0 : i32
    %34 = arith.cmpi eq, %arg1, %c0_i32_19 : i32
    %35 = arith.extui %34 : i1 to i32
    %c0_i32_20 = arith.constant 0 : i32
    %36 = arith.cmpi ne, %35, %c0_i32_20 : i32
    scf.if %36 {
      %c8_i32 = arith.constant 8 : i32
      %37 = arith.muli %arg0, %c8_i32 : i32
      %38 = tpu.iota {dimensions = array<i32: 0>} : vector<8x1xi32>
      %39 = vector.broadcast %37 : i32 to vector<8x1xi32>
      %40 = arith.addi %39, %38 : vector<8x1xi32>
      %c0_i32_21 = arith.constant 0 : i32
      %41 = vector.broadcast %c0_i32_21 : i32 to vector<8x1xi32>
      %42 = arith.cmpi sge, %4, %41 : vector<8x1xi32>
      %c16_i32_22 = arith.constant 16 : i32
      %43 = vector.broadcast %c16_i32_22 : i32 to vector<8x1xi32>
      %44 = arith.cmpi slt, %4, %43 : vector<8x1xi32>
      %45 = arith.andi %42, %44 : vector<8x1xi1>
      %c8_i32_23 = arith.constant 8 : i32
      %46 = vector.broadcast %c8_i32_23 : i32 to vector<8x1xi32>
      %47 = arith.cmpi slt, %40, %46 : vector<8x1xi32>
      %48 = arith.andi %45, %47 : vector<8x1xi1>
      %c0_24 = arith.constant 0 : index
      %c0_25 = arith.constant 0 : index
      %49 = vector.load %arg5[%c0_24, %c0_25] : memref<8x1xf32, #tpu.memory_space<vmem>>, vector<8x1xf32>
      %c0_26 = arith.constant 0 : index
      %c0_27 = arith.constant 0 : index
      %50 = vector.load %arg6[%c0_26, %c0_27] : memref<8x1xf32, #tpu.memory_space<vmem>>, vector<8x1xf32>
      %51 = math.log %50 : vector<8x1xf32>
      %52 = arith.addf %49, %51 : vector<8x1xf32>
      %c0_28 = arith.constant 0 : index
      %c0_29 = arith.constant 0 : index
      %53 = vector.load %arg7[%c0_28, %c0_29] : memref<8x1xf32, #tpu.memory_space<vmem>>, vector<8x1xf32>
      %54 = arith.subf %53, %52 : vector<8x1xf32>
      %cst_30 = arith.constant 0.000000e+00 : f32
      %55 = vector.broadcast %cst_30 : f32 to vector<8x1xf32>
      %56 = arith.select %48, %54, %55 : vector<8x1xi1>, vector<8x1xf32>
      %57 = math.exp %56 : vector<8x1xf32>
      %cst_31 = arith.constant 1.000000e+00 : f32
      %58 = vector.broadcast %cst_31 : f32 to vector<8x1xf32>
      %59 = arith.subf %58, %57 : vector<8x1xf32>
      %cst_32 = arith.constant 0.000000e+00 : f32
      %60 = vector.broadcast %cst_32 : f32 to vector<8x1xf32>
      %61 = arith.maximumf %59, %60 : vector<8x1xf32>
      %cst_33 = arith.constant 1.000000e+00 : f32
      %62 = vector.broadcast %cst_33 : f32 to vector<8x1xf32>
      %63 = arith.mulf %62, %61 : vector<8x1xf32>
      %64 = arith.mulf %63, %61 : vector<8x1xf32>
      %65 = arith.mulf %64, %56 : vector<8x1xf32>
      %c0_34 = arith.constant 0 : index
      %c0_35 = arith.constant 0 : index
      %66 = vector.load %arg4[%c0_34, %c0_35] : memref<8x1xf32, #tpu.memory_space<vmem>>, vector<8x1xf32>
      tpu.vector_store %arg4[%c0_34, %c0_35], %65 {strides = array<i32>} : memref<8x1xf32, #tpu.memory_space<vmem>>, vector<8x1xf32>,
    } else {
    }
    return
  }
  func.func @transform_0(%arg0: i32, %arg1: i32) -> (i32, i32) {
    %c0_i32 = arith.constant 0 : i32
    return %arg0, %arg1 : i32, i32
  }
  func.func @transform_1(%arg0: i32, %arg1: i32) -> (i32, i32) {
    %c0_i32 = arith.constant 0 : i32
    %c0_i32_0 = arith.constant 0 : i32
    return %arg0, %c0_i32 : i32, i32
  }
  func.func @transform_2(%arg0: i32, %arg1: i32) -> (i32, i32) {
    %c0_i32 = arith.constant 0 : i32
    %c0_i32_0 = arith.constant 0 : i32
    return %arg0, %c0_i32 : i32, i32
  }
}

</mosaic_0001>

<bundles_post_ra>
// kernel: tpu_custom_call.1
= control target key start
LH: loop header
LB: loop body
LE: loop exit
PB: predicated region body
PF: predicated region fallthrough
CT: control target
= control target key end

     0   :  { %vm27_vm0 = vcmask 130048   ;;  %vm15_vm1 = vcmask 7168   ;;  %v108_v1 = vmov -inf   ;;  %v109_v3 = vmov 0   ;;  %s145_s0 = inlined_call_operand.vmem [shape: f32[8,16], index: 0, kind: input, shape index: {}]   ;;  %s146_s1 = inlined_call_operand.vmem [shape: s32[8,1], index: 1, kind: input, shape index: {}]   ;;  %s147_s2 = inlined_call_operand.vmem [shape: f32[8,1], index: 2, kind: output, shape index: {}]  }
   0x1   :  { %v19_v0 = vld [vmem:[%s145_s0] sm:$0xff]  ;;  %16 = vst.msk [vmem:[#allocation2] sm:$0xff] %vm15_vm1, %v108_v1  ;;  %98 = vset.pattern.permute.xlu0 %v109_v3  ;;  %99 = vset.pattern.permute.xlu1 %v109_v3  ;;  %v110_v5 = vmov 0.0   ;;  %v22_v13 = vlaneseq }
   0x2   :  { %v28_v2 = vsel %vm27_vm0, %v19_v0, -inf  ;;  %v20_v4 = vld [vmem:[%s146_s1] sm:$0xff]  ;;  %17 = vst.msk [vmem:[#allocation3] sm:$0xff] %vm15_vm1, %v110_v5  ;;  %18 = vst.msk [vmem:[#allocation4] sm:$0xff] %vm15_vm1, %v110_v5 }
   0x3   :  { %29 = vmax.xlane.f32.xlu0 %v28_v2  ;;  %54 = vperm.xlu1 %99, %v20_v4   ;;  %v23_v14 = vand.u32 127, %v22_v13  ;;  %vm71_vm3 = vcmp.ge.s32.totalorder %v20_v4, 0  ;;  %vm72_vm4 = vcmp.lt.s32.totalorder %v20_v4, 16 }
   0x4   :  { %vm73_vm5 = vmand %vm71_vm3, %vm72_vm4 }
   0x8   :  { %v26_v6 = vld [vmem:[#allocation2] sm:$0xff] }
   0x9   :  { %v32_v22 = vld [vmem:[#allocation3] sm:$0xff]  ;;  %v52_v26 = vld [vmem:[#allocation4] sm:$0xff] }
  0x7e   :  { %v55_v15 = vpop.permute.xlu1 %54 }
  0x7f   :  { %vm56_vm2 = vcmp.eq.s32.totalorder %v23_v14, %v55_v15 }
  0x80   :  { %v57_v17 = vsel %vm56_vm2, %v19_v0, 0.0 }
  0x81   :  { %v58_v19 = vsel %vm27_vm0, %v57_v17, 0.0 }
  0x8c   :  { %v30_v7 = vpop.xlane.xlu0 %29 }
  0x8d   :  { %v31_v8 = vmax.f32 %v26_v6, %v30_v7 }
  0x8f   :  { %v33_v9 = vsub.f32 %v26_v6, %v31_v8  ;;  %51 = vst.msk [vmem:[#allocation2] sm:$0xff] %vm15_vm1, %v31_v8  ;;  %39 = vperm.xlu0 %98, %v31_v8  }
  0x91   :  { %v34_v20 = vmul.f32 1.442695, %v33_v9 }
  0x96   :  { %v76_v32 = vld [vmem:[#allocation2] sm:$0xff] }
 0x10a   :  { %v40_v10 = vpop.permute.xlu0 %39 }
 0x10b   :  { %v42_v11 = vsub.f32 %v19_v0, %v40_v10 }
 0x10d   :  { %v43_v12 = vmul.f32 1.442695, %v42_v11 }
 0x10f   :  { %100 = vpow2.f32 %v43_v12 }
 0x110   :  { %102 = vpow2.f32 %v34_v20 }
 0x11c   :  { %v101_v16 = vpop.eup %100 }
 0x11d   :  { %v45_v18 = vsel %vm27_vm0, %v101_v16, 0.0  ;;  %v103_v21 = vpop.eup %102 }
 0x11e   :  { %46 = vadd.xlane.f32.xlu1 %v45_v18  ;;  %v36_v23 = vmul.f32 %v103_v21, %v32_v22 }
 0x122   :  { %59 = vadd.xlane.f32.xlu1 %v58_v19 }
 0x1a7   :  { %v47_v24 = vpop.xlane.xlu1 %46 }
 0x1a8   :  { %v48_v25 = vadd.f32 %v47_v24, %v36_v23 }
 0x1aa   :  { %50 = vst.msk [vmem:[#allocation3] sm:$0xff] %vm15_vm1, %v48_v25 }
 0x1ab   :  { %v60_v27 = vpop.xlane.xlu1 %59 }
 0x1ac   :  { %v61_v28 = vadd.f32 %v60_v27, %v52_v26 }
 0x1ae   :  { %62 = vst.msk [vmem:[#allocation4] sm:$0xff] %vm15_vm1, %v61_v28 }
 0x1b1   :  { %v77_v29 = vld [vmem:[#allocation3] sm:$0xff] }
 0x1b2   :  { %104 = vlog2.f32 %v77_v29 }
 0x1b5   :  { %v81_v33 = vld [vmem:[#allocation4] sm:$0xff] }
 0x1bf   :  { %v105_v30 = vpop.eup %104 }
 0x1c0   :  { %v79_v31 = vmul.f32 0.6931472, %v105_v30 }
 0x1c2   :  { %v80_v34 = vadd.f32 %v79_v31, %v76_v32 }
 0x1c4   :  { %v82_v35 = vsub.f32 %v81_v33, %v80_v34 }
 0x1c6   :  { %v83_v36 = vsel %vm73_vm5, %v82_v35, 0.0 }
 0x1c7   :  { %v84_v37 = vmul.f32 1.442695, %v83_v36 }
 0x1c9   :  { %106 = vpow2.f32 %v84_v37 }
 0x1d6   :  { %v107_v38 = vpop.eup %106 }
 0x1d7   :  { %v86_v39 = vsub.f32 1.0, %v107_v38 }
 0x1d9   :  { %v87_v40 = vmax.f32 %v86_v39, 0.0 }
 0x1db   :  { %v88_v41 = vmul.f32 %v87_v40, %v87_v40 }
 0x1dd   :  { %v89_v42 = vmul.f32 %v88_v41, %v83_v36 }
 0x1df   :  { %90 = vst.msk [vmem:[%s147_s2] sm:$0xff] %vm15_vm1, %v89_v42 }

</bundles_post_ra>
